<compile_context>
chip_gen: v5e
topology: v5e:2x2
jax: 0.10.0
libtpu: 0.0.40
codegen_flags: <defaults>
</compile_context>

<pallas_src>
import jax
import jax.numpy as jnp
from jax.experimental import pallas as pl
from jax.experimental.pallas import tpu as pltpu

LANE = 128  # lane width of a TPU vreg; channel tile size


def _make_dwconv_kernel(H, W, c_tile, strip_h):
    def dwconv_kernel(x_ref, w_ref, b_ref, o_ref, xpad_ref):
        # x_ref:    (H, W, c_tile)       one image, one 128-channel tile
        # w_ref:    (3, 3, c_tile)       depthwise taps, channels-last
        # b_ref:    (1, c_tile)          bias
        # o_ref:    (H, W, c_tile)
        # xpad_ref: (H+2, W+2, c_tile)   VMEM scratch with zero halo border
        dt = xpad_ref.dtype

        # Zero the 1-pixel halo border (interior is overwritten below).
        # Done every grid step: cheap, and safe under megacore grid sharding.
        xpad_ref[0:1, :, :] = jnp.zeros((1, W + 2, c_tile), dt)
        xpad_ref[H + 1:H + 2, :, :] = jnp.zeros((1, W + 2, c_tile), dt)
        xpad_ref[:, 0:1, :] = jnp.zeros((H + 2, 1, c_tile), dt)
        xpad_ref[:, W + 1:W + 2, :] = jnp.zeros((H + 2, 1, c_tile), dt)

        # In-VMEM padding: replaces the former host-side jnp.pad (which cost a
        # full extra HBM read+write of the activation before the kernel ran).
        xpad_ref[1:H + 1, 1:W + 1, :] = x_ref[...]

        # Per-channel taps / bias, read once per grid step.
        taps = [[w_ref[kh, kw, :].astype(jnp.float32) for kw in range(3)]
                for kh in range(3)]
        bias = b_ref[0, :].astype(jnp.float32)

        def do_strip(r0, sh):
            # Output rows [r0, r0+sh); needs padded rows [r0, r0+sh+2).
            # Accumulator initialised with the bias (no separate add pass).
            acc = jnp.broadcast_to(bias, (sh, W, c_tile))
            for kw in range(3):
                # Hoisted sublane (W) shift: loaded once, reused for all kh.
                slab = xpad_ref[pl.ds(r0, sh + 2), kw:kw + W, :].astype(jnp.float32)
                for kh in range(3):
                    acc = acc + slab[kh:kh + sh, :, :] * taps[kh][kw]
            o_ref[pl.ds(r0, sh), :, :] = acc.astype(o_ref.dtype)

        n_full = H // strip_h

        def body(i, carry):
            do_strip(pl.multiple_of(i * strip_h, strip_h), strip_h)
            return carry

        jax.lax.fori_loop(0, n_full, body, 0)

        rem = H - n_full * strip_h
        if rem > 0:
            do_strip(n_full * strip_h, rem)

    return dwconv_kernel


def dwconv_pallas(x, weight, bias, H, W):
    """x: (B, N, C) with N == H*W; weight: (C, 1, 3, 3); bias: (C,).

    Returns (B, N, C), matching PyTorch DWConv.forward(x, H, W).
    """
    B, N, C = x.shape
    assert N == H * W

    # (B, N, C) -> (B, H, W, C): same element order PyTorch sees as (B,C,H,W)
    # after its transpose + reshape.
    x_hwc = x.reshape(B, H, W, C)

    # PyTorch depthwise weight (C, 1, 3, 3) -> channels-last taps (3, 3, C).
    w_taps = jnp.transpose(weight[:, 0, :, :], (1, 2, 0))
    b2d = bias.reshape(1, C)

    # Pad the channel axis to a multiple of 128 lanes (zero taps / bias keep
    # padded lanes inert).  The real module (dim=768) needs no padding.
    Cp = ((C + LANE - 1) // LANE) * LANE
    if Cp != C:
        pad_c = Cp - C
        x_hwc = jnp.pad(x_hwc, ((0, 0), (0, 0), (0, 0), (0, pad_c)))
        w_taps = jnp.pad(w_taps, ((0, 0), (0, 0), (0, pad_c)))
        b2d = jnp.pad(b2d, ((0, 0), (0, pad_c)))
    n_ct = Cp // LANE

    # Row-strip height: keep the f32 accumulator at <= ~16 vregs
    # (strip_h * ceil(W/8) vregs per 128-lane channel tile).
    w_vregs = -(-W // 8)
    strip_h = max(1, min(H, 16 // max(1, w_vregs)))

    kernel = _make_dwconv_kernel(H, W, LANE, strip_h)

    # VMEM budget: double-buffered in/out blocks + the padded scratch.
    itemsize = jnp.dtype(x.dtype).itemsize
    blk_bytes = H * W * LANE * itemsize
    scratch_bytes = (H + 2) * (W + 2) * LANE * itemsize
    need = 4 * blk_bytes + scratch_bytes + 4 * (9 + 1) * LANE * 4
    vmem_limit = int(min(max(need * 3 // 2 + (1 << 20), 16 << 20), 56 << 20))

    out_hwc = pl.pallas_call(
        kernel,
        out_shape=jax.ShapeDtypeStruct((B, H, W, Cp), x.dtype),
        grid_spec=pltpu.PrefetchScalarGridSpec(
            num_scalar_prefetch=0,
            grid=(B, n_ct),
            in_specs=[
                pl.BlockSpec((None, H, W, LANE), lambda b, c: (b, 0, 0, c)),
                pl.BlockSpec((3, 3, LANE), lambda b, c: (0, 0, c)),
                pl.BlockSpec((1, LANE), lambda b, c: (0, c)),
            ],
            out_specs=pl.BlockSpec((None, H, W, LANE), lambda b, c: (b, 0, 0, c)),
            scratch_shapes=[pltpu.VMEM((H + 2, W + 2, LANE), x.dtype)],
        ),
        compiler_params=pltpu.CompilerParams(
            dimension_semantics=("parallel", "parallel"),
            vmem_limit_bytes=vmem_limit,
        ),
    )(x_hwc, w_taps, b2d)

    out = out_hwc[..., :C] if Cp != C else out_hwc
    return out.reshape(B, N, C)


def dwconv_reference(x, weight, bias, H, W):
    """Pure-JAX reference reproducing the PyTorch module exactly."""
    B, N, C = x.shape
    x_nchw = jnp.transpose(x, (0, 2, 1)).reshape(B, C, H, W)
    out = jax.lax.conv_general_dilated(
        x_nchw, weight,
        window_strides=(1, 1),
        padding=((1, 1), (1, 1)),
        dimension_numbers=("NCHW", "OIHW", "NCHW"),
        feature_group_count=C,
    )
    out = out + bias.reshape(1, C, 1, 1)
    return jnp.transpose(out.reshape(B, C, H * W), (0, 2, 1))


if __name__ == "__main__":
    key = jax.random.PRNGKey(0)
    key_a, key_b = jax.random.split(key)

    # Small but lane-dense config: one full 128-channel tile
    # (the real module default is dim=768 = 6 tiles of 128).
    B, C, H, W = 2, 128, 16, 16
    N = H * W
    kx, kw, kb = jax.random.split(key_a, 3)
    x = jax.random.normal(kx, (B, N, C), dtype=jnp.float32)
    weight = jax.random.normal(kw, (C, 1, 3, 3), dtype=jnp.float32) * 0.1
    bias = jax.random.normal(kb, (C,), dtype=jnp.float32) * 0.1

    out = jax.block_until_ready(dwconv_pallas(x, weight, bias, H, W))
    ref = jax.block_until_ready(dwconv_reference(x, weight, bias, H, W))
    assert out.shape == (B, N, C)
    assert jnp.allclose(out, ref, atol=1e-5, rtol=1e-4), "mismatch (C=128)"

    # Also exercise the C % 128 != 0 padding path and a partial row strip.
    B2, C2, H2, W2 = 1, 72, 12, 16
    N2 = H2 * W2
    kx2, kw2, kb2 = jax.random.split(key_b, 3)
    x2 = jax.random.normal(kx2, (B2, N2, C2), dtype=jnp.float32)
    weight2 = jax.random.normal(kw2, (C2, 1, 3, 3), dtype=jnp.float32) * 0.1
    bias2 = jax.random.normal(kb2, (C2,), dtype=jnp.float32) * 0.1

    out2 = jax.block_until_ready(dwconv_pallas(x2, weight2, bias2, H2, W2))
    ref2 = jax.block_until_ready(dwconv_reference(x2, weight2, bias2, H2, W2))
    assert out2.shape == (B2, N2, C2)
    assert jnp.allclose(out2, ref2, atol=1e-5, rtol=1e-4), "mismatch (C=72)"

    print("KERNEL_OK")
</pallas_src>

<mosaic_0001>
module attributes {stable_mosaic.version = 11 : i64} {
  func.func @dwconv_kernel(%arg0: i32, %arg1: i32, %arg2: memref<1x16x16x128xf32, #tpu.memory_space<vmem>>, %arg3: memref<3x3x128xf32, #tpu.memory_space<vmem>>, %arg4: memref<1x128xf32, #tpu.memory_space<vmem>>, %arg5: memref<1x16x16x128xf32, #tpu.memory_space<vmem>>, %arg6: memref<18x18x128xf32, #tpu.memory_space<vmem>>) attributes {dimension_semantics = [#tpu.dimension_semantics<parallel>, #tpu.dimension_semantics<parallel>], iteration_bounds = array<i64: 2, 1>, scalar_prefetch = 0 : i64, scratch_operands = 1 : i64, tpu.core_type = #tpu.core_type<tc>, window_params = [{transform_indices = @transform_0, window_bounds = array<i64: 1, 16, 16, 128>}, {transform_indices = @transform_1, window_bounds = array<i64: 3, 3, 128>}, {transform_indices = @transform_2, window_bounds = array<i64: 1, 128>}, {transform_indices = @transform_3, window_bounds = array<i64: 1, 16, 16, 128>}]} {
    %cst = arith.constant 0.000000e+00 : f32
    %0 = vector.broadcast %cst : f32 to vector<1x18x128xf32>
    %c0 = arith.constant 0 : index
    %c0_0 = arith.constant 0 : index
    %c0_1 = arith.constant 0 : index
    %1 = vector.load %arg6[%c0, %c0_0, %c0_1] : memref<18x18x128xf32, #tpu.memory_space<vmem>>, vector<1x18x128xf32>
    tpu.vector_store %arg6[%c0, %c0_0, %c0_1], %0 {strides = array<i32>} : memref<18x18x128xf32, #tpu.memory_space<vmem>>, vector<1x18x128xf32>,
    %cst_2 = arith.constant 0.000000e+00 : f32
    %2 = vector.broadcast %cst_2 : f32 to vector<1x18x128xf32>
    %c17 = arith.constant 17 : index
    %c0_3 = arith.constant 0 : index
    %c0_4 = arith.constant 0 : index
    %3 = vector.load %arg6[%c17, %c0_3, %c0_4] : memref<18x18x128xf32, #tpu.memory_space<vmem>>, vector<1x18x128xf32>
    tpu.vector_store %arg6[%c17, %c0_3, %c0_4], %2 {strides = array<i32>} : memref<18x18x128xf32, #tpu.memory_space<vmem>>, vector<1x18x128xf32>,
    %cst_5 = arith.constant 0.000000e+00 : f32
    %4 = vector.broadcast %cst_5 : f32 to vector<18x1x128xf32>
    %c0_6 = arith.constant 0 : index
    %c0_7 = arith.constant 0 : index
    %c0_8 = arith.constant 0 : index
    %5 = vector.load %arg6[%c0_6, %c0_7, %c0_8] : memref<18x18x128xf32, #tpu.memory_space<vmem>>, vector<18x1x128xf32>
    tpu.vector_store %arg6[%c0_6, %c0_7, %c0_8], %4 {strides = array<i32>} : memref<18x18x128xf32, #tpu.memory_space<vmem>>, vector<18x1x128xf32>,
    %cst_9 = arith.constant 0.000000e+00 : f32
    %6 = vector.broadcast %cst_9 : f32 to vector<18x1x128xf32>
    %c0_10 = arith.constant 0 : index
    %c17_11 = arith.constant 17 : index
    %c0_12 = arith.constant 0 : index
    %7 = vector.load %arg6[%c0_10, %c17_11, %c0_12] : memref<18x18x128xf32, #tpu.memory_space<vmem>>, vector<18x1x128xf32>
    tpu.vector_store %arg6[%c0_10, %c17_11, %c0_12], %6 {strides = array<i32>} : memref<18x18x128xf32, #tpu.memory_space<vmem>>, vector<18x1x128xf32>,
    %c0_13 = arith.constant 0 : index
    %c0_14 = arith.constant 0 : index
    %c0_15 = arith.constant 0 : index
    %c0_16 = arith.constant 0 : index
    %8 = vector.load %arg2[%c0_13, %c0_14, %c0_15, %c0_16] : memref<1x16x16x128xf32, #tpu.memory_space<vmem>>, vector<1x16x16x128xf32>
    %9 = vector.shape_cast %8 : vector<1x16x16x128xf32> to vector<16x16x128xf32>
    %c1 = arith.constant 1 : index
    %c1_17 = arith.constant 1 : index
    %c0_18 = arith.constant 0 : index
    %10 = vector.load %arg6[%c1, %c1_17, %c0_18] : memref<18x18x128xf32, #tpu.memory_space<vmem>>, vector<16x16x128xf32>
    tpu.vector_store %arg6[%c1, %c1_17, %c0_18], %9 {strides = array<i32>} : memref<18x18x128xf32, #tpu.memory_space<vmem>>, vector<16x16x128xf32>,
    %c0_19 = arith.constant 0 : index
    %c0_20 = arith.constant 0 : index
    %c0_21 = arith.constant 0 : index
    %11 = vector.load %arg3[%c0_19, %c0_20, %c0_21] : memref<3x3x128xf32, #tpu.memory_space<vmem>>, vector<1x1x128xf32>
    %12 = vector.shape_cast %11 : vector<1x1x128xf32> to vector<128xf32>
    %c0_22 = arith.constant 0 : index
    %c1_23 = arith.constant 1 : index
    %c0_24 = arith.constant 0 : index
    %13 = vector.load %arg3[%c0_22, %c1_23, %c0_24] : memref<3x3x128xf32, #tpu.memory_space<vmem>>, vector<1x1x128xf32>
    %14 = vector.shape_cast %13 : vector<1x1x128xf32> to vector<128xf32>
    %c0_25 = arith.constant 0 : index
    %c2 = arith.constant 2 : index
    %c0_26 = arith.constant 0 : index
    %15 = vector.load %arg3[%c0_25, %c2, %c0_26] : memref<3x3x128xf32, #tpu.memory_space<vmem>>, vector<1x1x128xf32>
    %16 = vector.shape_cast %15 : vector<1x1x128xf32> to vector<128xf32>
    %c1_27 = arith.constant 1 : index
    %c0_28 = arith.constant 0 : index
    %c0_29 = arith.constant 0 : index
    %17 = vector.load %arg3[%c1_27, %c0_28, %c0_29] : memref<3x3x128xf32, #tpu.memory_space<vmem>>, vector<1x1x128xf32>
    %18 = vector.shape_cast %17 : vector<1x1x128xf32> to vector<128xf32>
    %c1_30 = arith.constant 1 : index
    %c1_31 = arith.constant 1 : index
    %c0_32 = arith.constant 0 : index
    %19 = vector.load %arg3[%c1_30, %c1_31, %c0_32] : memref<3x3x128xf32, #tpu.memory_space<vmem>>, vector<1x1x128xf32>
    %20 = vector.shape_cast %19 : vector<1x1x128xf32> to vector<128xf32>
    %c1_33 = arith.constant 1 : index
    %c2_34 = arith.constant 2 : index
    %c0_35 = arith.constant 0 : index
    %21 = vector.load %arg3[%c1_33, %c2_34, %c0_35] : memref<3x3x128xf32, #tpu.memory_space<vmem>>, vector<1x1x128xf32>
    %22 = vector.shape_cast %21 : vector<1x1x128xf32> to vector<128xf32>
    %c2_36 = arith.constant 2 : index
    %c0_37 = arith.constant 0 : index
    %c0_38 = arith.constant 0 : index
    %23 = vector.load %arg3[%c2_36, %c0_37, %c0_38] : memref<3x3x128xf32, #tpu.memory_space<vmem>>, vector<1x1x128xf32>
    %24 = vector.shape_cast %23 : vector<1x1x128xf32> to vector<128xf32>
    %c2_39 = arith.constant 2 : index
    %c1_40 = arith.constant 1 : index
    %c0_41 = arith.constant 0 : index
    %25 = vector.load %arg3[%c2_39, %c1_40, %c0_41] : memref<3x3x128xf32, #tpu.memory_space<vmem>>, vector<1x1x128xf32>
    %26 = vector.shape_cast %25 : vector<1x1x128xf32> to vector<128xf32>
    %c2_42 = arith.constant 2 : index
    %c2_43 = arith.constant 2 : index
    %c0_44 = arith.constant 0 : index
    %27 = vector.load %arg3[%c2_42, %c2_43, %c0_44] : memref<3x3x128xf32, #tpu.memory_space<vmem>>, vector<1x1x128xf32>
    %28 = vector.shape_cast %27 : vector<1x1x128xf32> to vector<128xf32>
    %c0_45 = arith.constant 0 : index
    %c0_46 = arith.constant 0 : index
    %29 = vector.load %arg4[%c0_45, %c0_46] : memref<1x128xf32, #tpu.memory_space<vmem>>, vector<1x128xf32>
    %30 = vector.shape_cast %29 : vector<1x128xf32> to vector<128xf32>
    %c0_i32 = arith.constant 0 : i32
    %c2_i32 = arith.constant 2 : i32
    %31 = arith.addi %c0_i32, %c2_i32 : i32
    %c1_i32 = arith.constant 1 : i32
    scf.for %arg7 = %c0_i32 to %31 step %c1_i32  : i32 {
      %c8_i32 = arith.constant 8 : i32
      %32 = arith.muli %arg7, %c8_i32 : i32
      %33 = tpu.assume_multiple %32, 8 : i32
      %34 = vector.shape_cast %30 : vector<128xf32> to vector<1x1x128xf32>
      %35 = vector.broadcast %34 : vector<1x1x128xf32> to vector<8x16x128xf32>
      %36 = arith.index_cast %33 : i32 to index
      %c0_48 = arith.constant 0 : index
      %c0_49 = arith.constant 0 : index
      %37 = vector.load %arg6[%36, %c0_48, %c0_49] : memref<18x18x128xf32, #tpu.memory_space<vmem>>, vector<10x16x128xf32>
      %38 = vector.extract_strided_slice %37 {offsets = [0, 0, 0], sizes = [8, 16, 128], strides = [1, 1, 1]} : vector<10x16x128xf32> to vector<8x16x128xf32>
      %39 = vector.shape_cast %12 : vector<128xf32> to vector<1x1x128xf32>
      %40 = vector.broadcast %39 : vector<1x1x128xf32> to vector<8x16x128xf32>
      %41 = arith.mulf %38, %40 : vector<8x16x128xf32>
      %42 = arith.addf %35, %41 : vector<8x16x128xf32>
      %43 = vector.extract_strided_slice %37 {offsets = [1, 0, 0], sizes = [8, 16, 128], strides = [1, 1, 1]} : vector<10x16x128xf32> to vector<8x16x128xf32>
      %44 = vector.shape_cast %18 : vector<128xf32> to vector<1x1x128xf32>
      %45 = vector.broadcast %44 : vector<1x1x128xf32> to vector<8x16x128xf32>
      %46 = arith.mulf %43, %45 : vector<8x16x128xf32>
      %47 = arith.addf %42, %46 : vector<8x16x128xf32>
      %48 = vector.extract_strided_slice %37 {offsets = [2, 0, 0], sizes = [8, 16, 128], strides = [1, 1, 1]} : vector<10x16x128xf32> to vector<8x16x128xf32>
      %49 = vector.shape_cast %24 : vector<128xf32> to vector<1x1x128xf32>
      %50 = vector.broadcast %49 : vector<1x1x128xf32> to vector<8x16x128xf32>
      %51 = arith.mulf %48, %50 : vector<8x16x128xf32>
      %52 = arith.addf %47, %51 : vector<8x16x128xf32>
      %53 = arith.index_cast %33 : i32 to index
      %c1_50 = arith.constant 1 : index
      %c0_51 = arith.constant 0 : index
      %54 = vector.load %arg6[%53, %c1_50, %c0_51] : memref<18x18x128xf32, #tpu.memory_space<vmem>>, vector<10x16x128xf32>
      %55 = vector.extract_strided_slice %54 {offsets = [0, 0, 0], sizes = [8, 16, 128], strides = [1, 1, 1]} : vector<10x16x128xf32> to vector<8x16x128xf32>
      %56 = vector.shape_cast %14 : vector<128xf32> to vector<1x1x128xf32>
      %57 = vector.broadcast %56 : vector<1x1x128xf32> to vector<8x16x128xf32>
      %58 = arith.mulf %55, %57 : vector<8x16x128xf32>
      %59 = arith.addf %52, %58 : vector<8x16x128xf32>
      %60 = vector.extract_strided_slice %54 {offsets = [1, 0, 0], sizes = [8, 16, 128], strides = [1, 1, 1]} : vector<10x16x128xf32> to vector<8x16x128xf32>
      %61 = vector.shape_cast %20 : vector<128xf32> to vector<1x1x128xf32>
      %62 = vector.broadcast %61 : vector<1x1x128xf32> to vector<8x16x128xf32>
      %63 = arith.mulf %60, %62 : vector<8x16x128xf32>
      %64 = arith.addf %59, %63 : vector<8x16x128xf32>
      %65 = vector.extract_strided_slice %54 {offsets = [2, 0, 0], sizes = [8, 16, 128], strides = [1, 1, 1]} : vector<10x16x128xf32> to vector<8x16x128xf32>
      %66 = vector.shape_cast %26 : vector<128xf32> to vector<1x1x128xf32>
      %67 = vector.broadcast %66 : vector<1x1x128xf32> to vector<8x16x128xf32>
      %68 = arith.mulf %65, %67 : vector<8x16x128xf32>
      %69 = arith.addf %64, %68 : vector<8x16x128xf32>
      %70 = arith.index_cast %33 : i32 to index
      %c2_52 = arith.constant 2 : index
      %c0_53 = arith.constant 0 : index
      %71 = vector.load %arg6[%70, %c2_52, %c0_53] : memref<18x18x128xf32, #tpu.memory_space<vmem>>, vector<10x16x128xf32>
      %72 = vector.extract_strided_slice %71 {offsets = [0, 0, 0], sizes = [8, 16, 128], strides = [1, 1, 1]} : vector<10x16x128xf32> to vector<8x16x128xf32>
      %73 = vector.shape_cast %16 : vector<128xf32> to vector<1x1x128xf32>
      %74 = vector.broadcast %73 : vector<1x1x128xf32> to vector<8x16x128xf32>
      %75 = arith.mulf %72, %74 : vector<8x16x128xf32>
      %76 = arith.addf %69, %75 : vector<8x16x128xf32>
      %77 = vector.extract_strided_slice %71 {offsets = [1, 0, 0], sizes = [8, 16, 128], strides = [1, 1, 1]} : vector<10x16x128xf32> to vector<8x16x128xf32>
      %78 = vector.shape_cast %22 : vector<128xf32> to vector<1x1x128xf32>
      %79 = vector.broadcast %78 : vector<1x1x128xf32> to vector<8x16x128xf32>
      %80 = arith.mulf %77, %79 : vector<8x16x128xf32>
      %81 = arith.addf %76, %80 : vector<8x16x128xf32>
      %82 = vector.extract_strided_slice %71 {offsets = [2, 0, 0], sizes = [8, 16, 128], strides = [1, 1, 1]} : vector<10x16x128xf32> to vector<8x16x128xf32>
      %83 = vector.shape_cast %28 : vector<128xf32> to vector<1x1x128xf32>
      %84 = vector.broadcast %83 : vector<1x1x128xf32> to vector<8x16x128xf32>
      %85 = arith.mulf %82, %84 : vector<8x16x128xf32>
      %86 = arith.addf %81, %85 : vector<8x16x128xf32>
      %c0_54 = arith.constant 0 : index
      %87 = arith.index_cast %33 : i32 to index
      %c0_55 = arith.constant 0 : index
      %c0_56 = arith.constant 0 : index
      %88 = vector.load %arg5[%c0_54, %87, %c0_55, %c0_56] : memref<1x16x16x128xf32, #tpu.memory_space<vmem>>, vector<1x8x16x128xf32>
      %89 = vector.shape_cast %88 : vector<1x8x16x128xf32> to vector<8x16x128xf32>
      %90 = vector.shape_cast %86 : vector<8x16x128xf32> to vector<1x8x16x128xf32>
      tpu.vector_store %arg5[%c0_54, %87, %c0_55, %c0_56], %90 {strides = array<i32>} : memref<1x16x16x128xf32, #tpu.memory_space<vmem>>, vector<1x8x16x128xf32>,
    }
    %c2_i32_47 = arith.constant 2 : i32
    return
  }
  func.func @transform_0(%arg0: i32, %arg1: i32) -> (i32, i32, i32, i32) {
    %c0_i32 = arith.constant 0 : i32
    %c0_i32_0 = arith.constant 0 : i32
    %c0_i32_1 = arith.constant 0 : i32
    return %arg0, %c0_i32, %c0_i32_0, %arg1 : i32, i32, i32, i32
  }
  func.func @transform_1(%arg0: i32, %arg1: i32) -> (i32, i32, i32) {
    %c0_i32 = arith.constant 0 : i32
    %c0_i32_0 = arith.constant 0 : i32
    %c0_i32_1 = arith.constant 0 : i32
    return %c0_i32, %c0_i32_0, %arg1 : i32, i32, i32
  }
  func.func @transform_2(%arg0: i32, %arg1: i32) -> (i32, i32) {
    %c0_i32 = arith.constant 0 : i32
    %c0_i32_0 = arith.constant 0 : i32
    return %c0_i32, %arg1 : i32, i32
  }
  func.func @transform_3(%arg0: i32, %arg1: i32) -> (i32, i32, i32, i32) {
    %c0_i32 = arith.constant 0 : i32
    %c0_i32_0 = arith.constant 0 : i32
    %c0_i32_1 = arith.constant 0 : i32
    return %arg0, %c0_i32, %c0_i32_0, %arg1 : i32, i32, i32, i32
  }
}

</mosaic_0001>

<bundles_post_ra>
// kernel: tpu_custom_call.1
= control target key start
LH: loop header
LB: loop body
LE: loop exit
PB: predicated region body
PF: predicated region fallthrough
CT: control target
= control target key end

     0   :  { %s1861_s0 = inlined_call_operand.hbm [shape: f32[2,16,16,128], index: 0, kind: input, shape index: {}]   ;;  %s1862_s1 = inlined_call_operand.hbm [shape: f32[3,3,128], index: 1, kind: input, shape index: {}]   ;;  %s1863_s2 = inlined_call_operand.vmem [shape: f32[1,128], index: 2, kind: input, shape index: {}]   ;;  %s1864_s3 = inlined_call_operand.hbm [shape: f32[2,16,16,128], index: 3, kind: output, shape index: {}]  }
   0x1   :  { %1865 = sst [smem:[#allocation12_spill]] %s1862_s1 }
   0x2   :  { %8 = vsyncpa [#allocation4], 0 }
   0x3   :  { %10 = vsyncpa [#allocation4 + $0x1], 0 }
   0x4   :  { %11 = vsyncpa [#allocation7], 0 }
   0x5   :  { %12 = vsyncpa [#allocation5], 0 }
   0x6   :  { %14 = vsyncpa [#allocation5 + $0x1], 0  ;;  %s1184_s12 = smov 0   ;;  %s1186_s13 = smov 0  }
   0x7   :  { %s1188_s14 = smov 0   ;;  %s1190_s15 = smov 0  }
   0x8   :  { %s1192_s16 = smov 0   ;;  %s1194_s17 = smov 0  }
   0x9 LB: > { %s888_s18 = sadd.s32 4294967295, %s1150_s17   ;;  %s889_s19 = sadd.s32 4294967294, %s1150_s17   ;;  %s1150_s17 = sphi %s1194_s17, %s20_s17   ;;  %s1146_s16 = sphi %s1192_s16, %s1878_s16   ;;  %s1142_s15 = sphi %s1190_s15, %s1877_s15   ;;  %s1138_s14 = sphi %s1188_s14, %s1876_s14   ;;  %s1134_s13 = sphi %s1186_s13, %s1875_s13   ;;  %s1130_s12 = sphi %s1184_s12, %s1874_s12  }
   0xa   : > { %p54_p0 = scmp.ne.s32.totalorder %s1134_s13, %s1130_s12  ;;  %p1218_p1 = scmp.eq.s32.totalorder %s888_s18, 0 }
   0xb   : > { %p1222_p2 = scmp.eq.s32.totalorder %s888_s18, 1  ;;  %p138_p3 = scmp.eq.s32.totalorder %s889_s19, 1 }
   0xc   : > { %p1228_p4 = por %p1218_p1, %p54_p0  ;;  %p890_p5 = scmp.ge.s32.totalorder %s1150_s17, 1 }
   0xd   : > { %p1233_p6 = por %p138_p3, %p54_p0  ;;  %p145_p7 = scmp.lt.s32.totalorder %s1150_s17, 3 }
   0xe   : > { %s1870_s1 = sld [smem:[#allocation12_spill]]  ;;  %s1156_s28 = smov [#allocation6]  }
   0xf   : > { %p1241_p8 = pnand %p890_p5, %p145_p7  ;;  %s160_s29 = sshll.u32 %s1156_s28, 4  ;;  %s161_s29 = int_to_ptr.vmem [resolvable:$true] %s160_s29 }
  0x10   : > { %p893_p11 = scmp.ge.s32.totalorder %s1150_s17, 2  ;;  %s1157_s30 = smov 64  }
  0x11   : > { %p920_p9 = pneg %p1241_p8  ;;  %s1158_s4 = smov 4  }
  0x12   : > { %s32_s5 = sadd.s32 1, %s1146_s16  ;;  %s41_s6 = sadd.s32 1, %s1138_s14 }
  0x13   : > { %p921_p10 = pnand %p920_p9, %p1218_p1  ;;  %p34_p12 = scmp.ge.s32.totalorder %s32_s5, 2 }
  0x14   : > { %s158_s26 = sshll.u32 %s1870_s1, 4  ;;  %p48_p13 = scmp.ne.s32.totalorder %s1138_s14, %s1134_s13  ;;  %s159_s26 = int_to_ptr.hbm [resolvable:$true] %s158_s26 }
  0x15   : > { %923 = dma.hbm_to_vmem [thread:$0]  (!%p921_p10), %s159_s26, 192, %s161_s29, [#allocation7], %s1157_s30, %s1157_s30, %s1158_s4  }
  0x16   : > { %p49_p0 = scmp.eq.s32.totalorder %s1150_s17, 0  ;;  %s1880_s5 = smov (%p34_p12, %s32_s5), 0 }
  0x17   : > { %p1263_p5 = por %p1222_p2, %p48_p13  ;;  %s36_s9 = ssub.s32 %s1146_s16, %s1880_s5 }
  0x18   : > { %p1257_p3 = por %p49_p0, %p48_p13  ;;  %p933_p7 = scmp.lt.s32.totalorder %s1150_s17, 2 }
  0x19   : > { %p39_p9 = scmp.eq.s32.totalorder %s36_s9, 0  ;;  %s180_s10 = sand.u32 1, %s1138_s14  }
  0x1a   : > { %s894_s11 = sshll.u32 %s180_s10, 8  ;;  %s909_s19 = sshll.u32 %s1146_s16, 8 }
  0x1b   : > { %s1272_s18 = scalar_select %p39_p9, %s1138_s14, %s41_s6  }
  0x1c   : > { %s190_s26 = scalar_lea.hbm %s1861_s0, %s909_s19  ;;  %s184_s28 = scalar_lea.vmem [#allocation3], %s894_s11 }
  0x1d   : > { %s193_s29 = sshll.u32 %s184_s28, 4  ;;  %s191_s21 = sshll.u32 %s190_s26, 4  ;;  %s194_s29 = int_to_ptr.vmem [resolvable:$true] %s193_s29  ;;  %s192_s21 = int_to_ptr.hbm [resolvable:$true] %s191_s21 }
  0x1e   : > { %p925_p2 = pnand %p933_p7, %p1257_p3  ;;  %s181_s30 = scalar_lea.sflag [#allocation4], %s180_s10 }
  0x1f   : > { %s1159_s4 = smov 128   ;;  %s1160_s1 = smov 8  }
  0x20   : > { %927 = dma.hbm_to_vmem [thread:$0]  (!%p925_p2), %s192_s21, 4096, %s194_s29, %s181_s30, %s1159_s4, %s1159_s4, %s1160_s1  }
  0x21   : > { %205 = sbr.rel (%p1241_p8) target bundleno = 209 (0xd1), region = 32  ;;  %s1283_s6 = sand.u32 (!%p1241_p8), 1, %s1134_s13  }
  0x22   : > { %s898_s9 = sshll.u32 (!%p1241_p8), %s1283_s6, 8  ;;  %s208_s11 = scalar_lea.sflag (!%p1241_p8), [#allocation4], %s1283_s6 }
  0x23   : > { %s1289_s19 = scalar_lea.vmem (!%p1241_p8), [#allocation3], %s898_s9 }
  0x26   : > { %1117 = dma.done.wait (%p1228_p4), %s208_s11, 4096  }
  0x27   : > { %1119 = vsyncadd (%p1228_p4), %s208_s11, 4294963200 }
  0x28   : > { %1121 = dma.done.wait (%p1218_p1), [#allocation7], 192  }
  0x29   : > { %1123 = vsyncadd (%p1218_p1), [#allocation7], 4294967104  ;;  %v1161_v0 = vmov 0.0   ;;  %v1299_v1 = vld [vmem:[#allocation6] sm:$0x1]  ;;  %v290_v12 = vld [vmem:[%s1289_s19 + $0x8] sm:$0xff] }
  0x2a   : > { %246 = vst [vmem:[#allocation2] sm:$0xff] %v1161_v0  ;;  %v1301_v2 = vld [vmem:[#allocation6 + $0x1] sm:$0x1]  ;;  %v1303_v3 = vld [vmem:[#allocation6 + $0x2] sm:$0x1]  ;;  %v291_v13 = vld [vmem:[%s1289_s19 + $0x10] sm:$0xff] }
  0x2b   : > { %247 = vst [vmem:[#allocation2 + $0x8] sm:$0xff] %v1161_v0  ;;  %v1305_v4 = vld [vmem:[#allocation6 + $0x4] sm:$0x1]  ;;  %v1307_v5 = vld [vmem:[#allocation6 + $0x5] sm:$0x1]  ;;  %v292_v14 = vld [vmem:[%s1289_s19 + $0x18] sm:$0xff] }
  0x2c   : > { %248 = vst [vmem:[#allocation2 + $0x10] sm:$0x3] %v1161_v0  ;;  %v1309_v6 = vld [vmem:[#allocation6 + $0x6] sm:$0x1]  ;;  %v1311_v7 = vld [vmem:[#allocation6 + $0x8] sm:$0x1] }
  0x2d   : > { %250 = vst [vmem:[#allocation2 + $0x198] sm:$0xff] %v1161_v0  ;;  %v1313_v8 = vld [vmem:[#allocation6 + $0x9] sm:$0x1]  ;;  %v1315_v9 = vld [vmem:[#allocation6 + $0xa] sm:$0x1]  ;;  %v289_v11 = vld [vmem:[%s1289_s19] sm:$0xff] }
  0x2e   : > { %251 = vst [vmem:[#allocation2 + $0x1a0] sm:$0xff] %v1161_v0  ;;  %v1320_v10 = vld [vmem:[%s1863_s2] sm:$0x1]  ;;  %v293_v15 = vld [vmem:[%s1289_s19 + $0x20] sm:$0xff]  ;;  %v294_v16 = vld [vmem:[%s1289_s19 + $0x28] sm:$0xff]  ;;  %s1356_s22 = scalar_lea.vmem [#allocation8], %s898_s9 }
  0x2f   : > { %252 = vst [vmem:[#allocation2 + $0x1a8] sm:$0x3] %v1161_v0  ;;  %v295_v17 = vld [vmem:[%s1289_s19 + $0x30] sm:$0xff]  ;;  %v296_v18 = vld [vmem:[%s1289_s19 + $0x38] sm:$0xff]  ;;  %v297_v19 = vld [vmem:[%s1289_s19 + $0x40] sm:$0xff]  ;;  %s1358_s27 = smov 0  }
  0x30   : > { %253 = vst [vmem:[#allocation2] sm:$0x1] %v1161_v0  ;;  %v298_v20 = vld [vmem:[%s1289_s19 + $0x48] sm:$0xff]  ;;  %v299_v21 = vld [vmem:[%s1289_s19 + $0x50] sm:$0xff]  ;;  %v300_v22 = vld [vmem:[%s1289_s19 + $0x58] sm:$0xff] }
  0x31   : > { %254 = vst [vmem:[#allocation2 + $0x18] sm:$0x1] %v1161_v0  ;;  %v301_v23 = vld [vmem:[%s1289_s19 + $0x60] sm:$0xff]  ;;  %v302_v24 = vld [vmem:[%s1289_s19 + $0x68] sm:$0xff]  ;;  %v303_v25 = vld [vmem:[%s1289_s19 + $0x70] sm:$0xff] }
  0x32   : > { %255 = vst [vmem:[#allocation2 + $0x30] sm:$0x1] %v1161_v0  ;;  %v304_v26 = vld [vmem:[%s1289_s19 + $0x78] sm:$0xff]  ;;  %v305_v27 = vld [vmem:[%s1289_s19 + $0x80] sm:$0xff]  ;;  %v306_v28 = vld [vmem:[%s1289_s19 + $0x88] sm:$0xff] }
  0x33   : > { %256 = vst [vmem:[#allocation2 + $0x48] sm:$0x1] %v1161_v0  ;;  %v307_v29 = vld [vmem:[%s1289_s19 + $0x90] sm:$0xff]  ;;  %v308_v30 = vld [vmem:[%s1289_s19 + $0x98] sm:$0xff]  ;;  %v309_v31 = vld [vmem:[%s1289_s19 + $0xa0] sm:$0xff] }
  0x34   : > { %257 = vst [vmem:[#allocation2 + $0x60] sm:$0x1] %v1161_v0  ;;  %v310_v32 = vld [vmem:[%s1289_s19 + $0xa8] sm:$0xff]  ;;  %v311_v33 = vld [vmem:[%s1289_s19 + $0xb0] sm:$0xff]  ;;  %v312_v34 = vld [vmem:[%s1289_s19 + $0xb8] sm:$0xff] }
  0x35   : > { %258 = vst [vmem:[#allocation2 + $0x78] sm:$0x1] %v1161_v0  ;;  %v313_v35 = vld [vmem:[%s1289_s19 + $0xc0] sm:$0xff]  ;;  %v314_v36 = vld [vmem:[%s1289_s19 + $0xc8] sm:$0xff]  ;;  %v315_v37 = vld [vmem:[%s1289_s19 + $0xd0] sm:$0xff] }
  0x36   : > { %259 = vst [vmem:[#allocation2 + $0x90] sm:$0x1] %v1161_v0  ;;  %v316_v38 = vld [vmem:[%s1289_s19 + $0xd8] sm:$0xff]  ;;  %v317_v39 = vld [vmem:[%s1289_s19 + $0xe0] sm:$0xff]  ;;  %v318_v40 = vld [vmem:[%s1289_s19 + $0xe8] sm:$0xff] }
  0x37   : > { %260 = vst [vmem:[#allocation2 + $0xa8] sm:$0x1] %v1161_v0  ;;  %v319_v41 = vld [vmem:[%s1289_s19 + $0xf0] sm:$0xff]  ;;  %v320_v42 = vld [vmem:[%s1289_s19 + $0xf8] sm:$0xff] }
  0x38   : > { %261 = vst [vmem:[#allocation2 + $0xc0] sm:$0x1] %v1161_v0 }
  0x39   : > { %262 = vst [vmem:[#allocation2 + $0xd8] sm:$0x1] %v1161_v0 }
  0x3a   : > { %263 = vst [vmem:[#allocation2 + $0xf0] sm:$0x1] %v1161_v0 }
  0x3b   : > { %264 = vst [vmem:[#allocation2 + $0x108] sm:$0x1] %v1161_v0 }
  0x3c   : > { %265 = vst [vmem:[#allocation2 + $0x120] sm:$0x1] %v1161_v0 }
  0x3d   : > { %266 = vst [vmem:[#allocation2 + $0x138] sm:$0x1] %v1161_v0 }
  0x3e   : > { %267 = vst [vmem:[#allocation2 + $0x150] sm:$0x1] %v1161_v0 }
  0x3f   : > { %268 = vst [vmem:[#allocation2 + $0x168] sm:$0x1] %v1161_v0 }
  0x40   : > { %269 = vst [vmem:[#allocation2 + $0x180] sm:$0x1] %v1161_v0 }
  0x41   : > { %272 = vst [vmem:[#allocation2 + $0x29] sm:$0x1] %v1161_v0 }
  0x42   : > { %273 = vst [vmem:[#allocation2 + $0x41] sm:$0x1] %v1161_v0 }
  0x43   : > { %274 = vst [vmem:[#allocation2 + $0x59] sm:$0x1] %v1161_v0 }
  0x44   : > { %275 = vst [vmem:[#allocation2 + $0x71] sm:$0x1] %v1161_v0 }
  0x45   : > { %276 = vst [vmem:[#allocation2 + $0x89] sm:$0x1] %v1161_v0 }
  0x46   : > { %277 = vst [vmem:[#allocation2 + $0xa1] sm:$0x1] %v1161_v0 }
  0x47   : > { %278 = vst [vmem:[#allocation2 + $0xb9] sm:$0x1] %v1161_v0 }
  0x48   : > { %279 = vst [vmem:[#allocation2 + $0xd1] sm:$0x1] %v1161_v0 }
  0x49   : > { %280 = vst [vmem:[#allocation2 + $0xe9] sm:$0x1] %v1161_v0 }
  0x4a   : > { %281 = vst [vmem:[#allocation2 + $0x101] sm:$0x1] %v1161_v0 }
  0x4b   : > { %282 = vst [vmem:[#allocation2 + $0x119] sm:$0x1] %v1161_v0 }
  0x4c   : > { %283 = vst [vmem:[#allocation2 + $0x131] sm:$0x1] %v1161_v0 }
  0x4d   : > { %284 = vst [vmem:[#allocation2 + $0x149] sm:$0x1] %v1161_v0 }
  0x4e   : > { %285 = vst [vmem:[#allocation2 + $0x161] sm:$0x1] %v1161_v0 }
  0x4f   : > { %286 = vst [vmem:[#allocation2 + $0x179] sm:$0x1] %v1161_v0 }
  0x50   : > { %287 = vst [vmem:[#allocation2 + $0x191] sm:$0x1] %v1161_v0 }
  0x51   : > { %270 = vst [vmem:[#allocation2 + $0x198] sm:$0x1] %v1161_v0 }
  0x52   : > { %271 = vst [vmem:[#allocation2 + $0x11] sm:$0x1] %v1161_v0 }
  0x53   : > { %288 = vst [vmem:[#allocation2 + $0x1a9] sm:$0x1] %v1161_v0 }
  0x54   : > { %322 = vst [vmem:[#allocation2 + $0x19] sm:$0xff] %v289_v11 }
  0x55   : > { %323 = vst [vmem:[#allocation2 + $0x21] sm:$0xff] %v290_v12 }
  0x56   : > { %324 = vst [vmem:[#allocation2 + $0x31] sm:$0xff] %v291_v13 }
  0x57   : > { %325 = vst [vmem:[#allocation2 + $0x39] sm:$0xff] %v292_v14 }
  0x58   : > { %326 = vst [vmem:[#allocation2 + $0x49] sm:$0xff] %v293_v15 }
  0x59   : > { %327 = vst [vmem:[#allocation2 + $0x51] sm:$0xff] %v294_v16 }
  0x5a   : > { %328 = vst [vmem:[#allocation2 + $0x61] sm:$0xff] %v295_v17 }
  0x5b   : > { %329 = vst [vmem:[#allocation2 + $0x69] sm:$0xff] %v296_v18 }
  0x5c   : > { %330 = vst [vmem:[#allocation2 + $0x79] sm:$0xff] %v297_v19 }
  0x5d   : > { %331 = vst [vmem:[#allocation2 + $0x81] sm:$0xff] %v298_v20 }
  0x5e   : > { %332 = vst [vmem:[#allocation2 + $0x91] sm:$0xff] %v299_v21 }
  0x5f   : > { %333 = vst [vmem:[#allocation2 + $0x99] sm:$0xff] %v300_v22 }
  0x60   : > { %334 = vst [vmem:[#allocation2 + $0xa9] sm:$0xff] %v301_v23 }
  0x61   : > { %335 = vst [vmem:[#allocation2 + $0xb1] sm:$0xff] %v302_v24 }
  0x62   : > { %336 = vst [vmem:[#allocation2 + $0xc1] sm:$0xff] %v303_v25 }
  0x63   : > { %337 = vst [vmem:[#allocation2 + $0xc9] sm:$0xff] %v304_v26 }
  0x64   : > { %338 = vst [vmem:[#allocation2 + $0xd9] sm:$0xff] %v305_v27 }
  0x65   : > { %339 = vst [vmem:[#allocation2 + $0xe1] sm:$0xff] %v306_v28 }
  0x66   : > { %340 = vst [vmem:[#allocation2 + $0xf1] sm:$0xff] %v307_v29 }
  0x67   : > { %341 = vst [vmem:[#allocation2 + $0xf9] sm:$0xff] %v308_v30 }
  0x68   : > { %342 = vst [vmem:[#allocation2 + $0x109] sm:$0xff] %v309_v31 }
  0x69   : > { %343 = vst [vmem:[#allocation2 + $0x111] sm:$0xff] %v310_v32 }
  0x6a   : > { %344 = vst [vmem:[#allocation2 + $0x121] sm:$0xff] %v311_v33 }
  0x6b   : > { %345 = vst [vmem:[#allocation2 + $0x129] sm:$0xff] %v312_v34 }
  0x6c   : > { %346 = vst [vmem:[#allocation2 + $0x139] sm:$0xff] %v313_v35 }
  0x6d   : > { %347 = vst [vmem:[#allocation2 + $0x141] sm:$0xff] %v314_v36 }
  0x6e   : > { %348 = vst [vmem:[#allocation2 + $0x151] sm:$0xff] %v315_v37 }
  0x6f   : > { %349 = vst [vmem:[#allocation2 + $0x159] sm:$0xff] %v316_v38 }
  0x70   : > { %350 = vst [vmem:[#allocation2 + $0x169] sm:$0xff] %v317_v39 }
  0x71   : > { %351 = vst [vmem:[#allocation2 + $0x171] sm:$0xff] %v318_v40 }
  0x72   : > { %352 = vst [vmem:[#allocation2 + $0x181] sm:$0xff] %v319_v41 }
  0x73   : > { %353 = vst [vmem:[#allocation2 + $0x189] sm:$0xff] %v320_v42 }
  0x74 LB: >> { %s902_s7 = smul.u32 192, %s1154_s27  ;;  %v1365_v43 = vperm.slane %v1299_v1, 0  ;;  %v1368_v44 = vperm.slane %v1305_v4, 0  ;;  %v1371_v45 = vperm.slane %v1320_v10, 0  ;;  %v1374_v46 = vperm.slane %v1311_v7, 0  ;;  %s910_s24 = sshll.u32 %s1154_s27, 7  ;;  %s1154_s27 = sphi %s1358_s27, %s371_s27  }
  0x75   : >> { %v1377_v47 = vperm.slane %v1301_v2, 0  ;;  %v1384_v50 = vperm.slane %v1307_v5, 0  ;;  %v1387_v51 = vperm.slane %v1313_v8, 0  ;;  %v1390_v52 = vperm.slane %v1303_v3, 0  ;;  %s1511_s25 = scalar_lea.vmem %s1356_s22, %s910_s24 [#allocation8]  ;;  %s371_s27 = sadd.s32 1, %s1154_s27  }
  0x76   : >> { %s1379_s10 = scalar_lea.vmem [#allocation2], %s902_s7  ;;  %v1396_v56 = vperm.slane %v1309_v6, 0  ;;  %v1404_v60 = vperm.slane %v1315_v9, 0  ;;  %p368_p1 = scmp.ge.s32.totalorder %s371_s27, 2  }
  0x77   : > { %s911_s26 = sshll.u32 (%p368_p1), %s1142_s15, 8  ;;  %s767_s30 = sshll.u32 (%p368_p1), %s1356_s22, 4  ;;  %s768_s30 = int_to_ptr.vmem [resolvable:$true] %s767_s30 }
  0x78   : > { %s766_s21 = scalar_lea.hbm (%p368_p1), %s1864_s3, %s911_s26  ;;  %s754_s9 = scalar_lea.sflag (%p368_p1), [#allocation5], %s1283_s6 }
  0x79   : > { %s769_s4 = sshll.u32 (%p368_p1), %s766_s21, 4  ;;  %s1080_s15 = scalar_lea.hbm (%p368_p1), %s1864_s3, 512  ;;  %s770_s4 = int_to_ptr.hbm [resolvable:$true] %s769_s4 }
  0x7a   : >> { %v378_v48 = vld [vmem:[%s1379_s10] sm:$0xff]  ;;  %v380_v49 = vld [vmem:[%s1379_s10 + $0x18] sm:$0xff]  ;;  %v1400_v58 = vld [vmem:[%s1379_s10 + $0x30] sm:$0xff]  ;;  %s1074_s11 = sshra.s32 (%p368_p1), %s770_s4, 4  ;;  %s1075_s11 = int_to_ptr.hbm [resolvable:$true] %s1074_s11 }
  0x7b   : >> { %v399_v53 = vmul.f32 %v1365_v43, %v378_v48  ;;  %v432_v54 = vmul.f32 %v1368_v44, %v380_v49  ;;  %v497_v55 = vld [vmem:[%s1379_s10 + $0x1] sm:$0xff]  ;;  %v401_v57 = vmul.f32 %v1365_v43, %v380_v49  ;;  %v465_v62 = vmul.f32 %v1374_v46, %v1400_v58  ;;  %v499_v63 = vld [vmem:[%s1379_s10 + $0x19] sm:$0xff]  ;;  %v1416_v14 = vld [vmem:[%s1379_s10 + $0x31] sm:$0xff]  ;;  %s1076_s19 = scalar_lea.hbm (%p368_p1), %s1075_s11, 256  ;;  %p1081_p12 = scmp.lt.s32.totalorder (%p368_p1), %s1075_s11, %s1864_s3 }
  0x7c   : >> { %v616_v59 = vld [vmem:[%s1379_s10 + $0x2] sm:$0xff]  ;;  %v518_v0 = vmul.f32 %v1377_v47, %v497_v55  ;;  %v434_v13 = vmul.f32 %v1368_v44, %v1400_v58  ;;  %v551_v15 = vmul.f32 %v1384_v50, %v499_v63  ;;  %v618_v16 = vld [vmem:[%s1379_s10 + $0x1a] sm:$0xff]  ;;  %v584_v22 = vmul.f32 %v1387_v51, %v1416_v14  ;;  %v1427_v23 = vld [vmem:[%s1379_s10 + $0x32] sm:$0xff]  ;;  %p1077_p4 = scmp.ne.s32.totalorder (%p368_p1), %s1075_s11, %s1076_s19  ;;  %p1082_p13 = scmp.lt.s32.totalorder (%p368_p1), %s1080_s15, %s1076_s19 }
  0x7d   : >> { %v415_v61 = vadd.f32 %v399_v53, %v1371_v45  ;;  %v379_v11 = vld [vmem:[%s1379_s10 + $0x8] sm:$0xff]  ;;  %v381_v12 = vld [vmem:[%s1379_s10 + $0x20] sm:$0xff]  ;;  %v417_v20 = vadd.f32 %v401_v57, %v1371_v45  ;;  %v637_v24 = vmul.f32 %v1390_v52, %v616_v59  ;;  %v670_v25 = vmul.f32 %v1396_v56, %v618_v16  ;;  %v1432_v26 = vld [vmem:[%s1379_s10 + $0x38] sm:$0xff] }
  0x7e   : >> { %v400_v17 = vmul.f32 %v1365_v43, %v379_v11  ;;  %v433_v18 = vmul.f32 %v1368_v44, %v381_v12  ;;  %v498_v19 = vld [vmem:[%s1379_s10 + $0x9] sm:$0xff]  ;;  %v1437_v28 = vmul.f32 %v1404_v60, %v1427_v23  ;;  %v466_v30 = vmul.f32 %v1374_v46, %v1432_v26  ;;  %v500_v34 = vld [vmem:[%s1379_s10 + $0x21] sm:$0xff]  ;;  %v1448_v35 = vld [vmem:[%s1379_s10 + $0x39] sm:$0xff]  ;;  %p1078_p8 = pnand (%p368_p1), %p1077_p4, %p1263_p5  ;;  %p1083_p0 = por (%p368_p1), %p1082_p13, %p1081_p12 }
  0x7f   : >> { %v448_v21 = vadd.f32 %v432_v54, %v415_v61  ;;  %v617_v27 = vld [vmem:[%s1379_s10 + $0xa] sm:$0xff]  ;;  %v519_v31 = vmul.f32 %v1377_v47, %v498_v19  ;;  %v450_v36 = vadd.f32 %v434_v13, %v417_v20  ;;  %v520_v38 = vmul.f32 %v1377_v47, %v499_v63  ;;  %v619_v42 = vld [vmem:[%s1379_s10 + $0x22] sm:$0xff]  ;;  %v1459_v53 = vld [vmem:[%s1379_s10 + $0x3a] sm:$0xff] }
  0x80   : >> { %v416_v29 = vadd.f32 %v400_v17, %v1371_v45  ;;  %v1444_v32 = vld [vmem:[%s1379_s10 + $0x48] sm:$0xff]  ;;  %v552_v40 = vmul.f32 %v1384_v50, %v500_v34  ;;  %v585_v41 = vmul.f32 %v1387_v51, %v1448_v35  ;;  %v638_v48 = vmul.f32 %v1390_v52, %v617_v27  ;;  %v1476_v19 = vld [vmem:[%s1379_s10 + $0x50] sm:$0xff]  ;;  %p1079_p10 = pneg (%p368_p1), %p1078_p8 }
  0x81   : >> { %v481_v33 = vadd.f32 %v465_v62, %v448_v21  ;;  %v467_v37 = vmul.f32 %v1374_v46, %v1444_v32  ;;  %v671_v54 = vmul.f32 %v1396_v56, %v619_v42  ;;  %v553_v57 = vmul.f32 %v1384_v50, %v1416_v14  ;;  %v1467_v62 = vld [vmem:[%s1379_s10 + $0x49] sm:$0xff] }
  0x82   : >> { %v449_v39 = vadd.f32 %v433_v18, %v416_v29  ;;  %v704_v61 = vmul.f32 %v1404_v60, %v1459_v53  ;;  %v402_v63 = vmul.f32 %v1365_v43, %v381_v12  ;;  %v586_v17 = vmul.f32 %v1387_v51, %v1467_v62  ;;  %v1479_v21 = vld [vmem:[%s1379_s10 + $0x4a] sm:$0xff]  ;;  %p1084_p3 = pnand (%p368_p1), %p1083_p0, %p1079_p10 }
  0x83   : >> { %v534_v49 = vadd.f32 %v518_v0, %v481_v33  ;;  %v483_v55 = vadd.f32 %v467_v37, %v450_v36  ;;  %v435_v0 = vmul.f32 %v1368_v44, %v1432_v26  ;;  %v639_v18 = vmul.f32 %v1390_v52, %v618_v16  ;;  %v1490_v37 = vld [vmem:[%s1379_s10 + $0x51] sm:$0xff] }
  0x84   : >> { %v482_v59 = vadd.f32 %v466_v30, %v449_v39  ;;  %v672_v12 = vmul.f32 %v1396_v56, %v1427_v23  ;;  %v418_v27 = vadd.f32 %v402_v63, %v1371_v45  ;;  %v705_v16 = vmul.f32 %v1404_v60, %v1479_v21 }
  0x85   : >> { %v567_v11 = vadd.f32 %v551_v15, %v534_v49  ;;  %v536_v13 = vadd.f32 %v520_v38, %v483_v55  ;;  %v468_v15 = vmul.f32 %v1374_v46, %v1476_v19  ;;  %v521_v33 = vmul.f32 %v1377_v47, %v500_v34 }
  0x86   : >> { %v535_v20 = vadd.f32 %v519_v31, %v482_v59  ;;  %v451_v31 = vadd.f32 %v435_v0, %v418_v27  ;;  %v403_v38 = vmul.f32 %v1365_v43, %v1400_v58  ;;  %v436_v39 = vmul.f32 %v1368_v44, %v1444_v32 }
  0x87   : >> { %v600_v29 = vadd.f32 %v584_v22, %v567_v11  ;;  %v569_v30 = vadd.f32 %v553_v57, %v536_v13  ;;  %v554_v55 = vmul.f32 %v1384_v50, %v1448_v35  ;;  %v587_v34 = vmul.f32 %v1387_v51, %v1490_v37 }
  0x88   : >> { %v568_v36 = vadd.f32 %v552_v40, %v535_v20  ;;  %v1502_v40 = vld [vmem:[%s1379_s10 + $0x60] sm:$0xff]  ;;  %v484_v59 = vadd.f32 %v468_v15, %v451_v31  ;;  %v419_v63 = vadd.f32 %v403_v38, %v1371_v45  ;;  %v640_v11 = vmul.f32 %v1390_v52, %v619_v42 }
  0x89   : >> { %v653_v49 = vadd.f32 %v637_v24, %v600_v29  ;;  %v602_v22 = vadd.f32 %v586_v17, %v569_v30  ;;  %v469_v58 = vmul.f32 %v1374_v46, %v1502_v40  ;;  %v673_v13 = vmul.f32 %v1396_v56, %v1459_v53  ;;  %v1532_v31 = vld [vmem:[%s1379_s10 + $0x61] sm:$0xff] }
  0x8a   : >> { %v601_v57 = vadd.f32 %v585_v41, %v568_v36  ;;  %v537_v41 = vadd.f32 %v521_v33, %v484_v59  ;;  %v452_v20 = vadd.f32 %v436_v39, %v419_v63  ;;  %v522_v27 = vmul.f32 %v1377_v47, %v1416_v14  ;;  %v1524_v36 = vld [vmem:[%s1379_s10 + $0x68] sm:$0xff] }
  0x8b   : >> { %v686_v0 = vadd.f32 %v670_v25, %v653_v49  ;;  %v655_v24 = vadd.f32 %v639_v18, %v602_v22  ;;  %v555_v18 = vmul.f32 %v1384_v50, %v1467_v62  ;;  %v404_v42 = vmul.f32 %v1365_v43, %v1432_v26 }
  0x8c   : >> { %v654_v17 = vadd.f32 %v638_v48, %v601_v57  ;;  %v570_v30 = vadd.f32 %v554_v55, %v537_v41  ;;  %v1521_v48 = vld [vmem:[%s1379_s10 + $0x52] sm:$0xff]  ;;  %v485_v33 = vadd.f32 %v469_v58, %v452_v20  ;;  %v437_v14 = vmul.f32 %v1368_v44, %v1476_v19 }
  0x8d   : >> { %v719_v15 = vadd.f32 %v1437_v28, %v686_v0  ;;  %v688_v25 = vadd.f32 %v672_v12, %v655_v24  ;;  %v706_v12 = vmul.f32 %v1404_v60, %v1521_v48  ;;  %v420_v26 = vadd.f32 %v404_v42, %v1371_v45  ;;  %v1553_v0 = vld [vmem:[%s1379_s10 + $0x69] sm:$0xff]  ;;  %v1562_v20 = vld [vmem:[%s1379_s10 + $0x78] sm:$0xff] }
  0x8e   : >> { %v687_v29 = vadd.f32 %v671_v54, %v654_v17  ;;  %v470_v54 = vmul.f32 %v1374_v46, %v1524_v36  ;;  %v603_v39 = vadd.f32 %v587_v34, %v570_v30  ;;  %v538_v49 = vadd.f32 %v522_v27, %v485_v33 }
  0x8f   : >> { %737 = vst [vmem:[%s1511_s25] sm:$0xff] %v719_v15  ;;  %v721_v28 = vadd.f32 %v705_v16, %v688_v25  ;;  %v588_v22 = vmul.f32 %v1387_v51, %v1532_v31  ;;  %v1541_v16 = vld [vmem:[%s1379_s10 + $0x62] sm:$0xff]  ;;  %v641_v55 = vmul.f32 %v1390_v52, %v1427_v23  ;;  %v674_v57 = vmul.f32 %v1396_v56, %v1479_v21  ;;  %v1567_v15 = vld [vmem:[%s1379_s10 + $0x6a] sm:$0xff] }
  0x90   : >> { %v720_v38 = vadd.f32 %v704_v61, %v687_v29  ;;  %v453_v59 = vadd.f32 %v437_v14, %v420_v26  ;;  %v523_v61 = vmul.f32 %v1377_v47, %v1448_v35  ;;  %v656_v34 = vadd.f32 %v640_v11, %v603_v39 }
  0x91   : >> { %739 = vst [vmem:[%s1511_s25 + $0x10] sm:$0xff] %v721_v28  ;;  %v571_v63 = vadd.f32 %v555_v18, %v538_v49  ;;  %v707_v58 = vmul.f32 %v1404_v60, %v1541_v16  ;;  %v405_v24 = vmul.f32 %v1365_v43, %v1444_v32  ;;  %v556_v17 = vmul.f32 %v1384_v50, %v1490_v37 }
  0x92   : >> { %738 = vst [vmem:[%s1511_s25 + $0x8] sm:$0xff] %v720_v38  ;;  %v486_v23 = vadd.f32 %v470_v54, %v453_v59  ;;  %v589_v41 = vmul.f32 %v1387_v51, %v1553_v0  ;;  %v438_v35 = vmul.f32 %v1368_v44, %v1502_v40  ;;  %v689_v11 = vadd.f32 %v673_v13, %v656_v34  ;;  %v1581_v54 = vld [vmem:[%s1379_s10 + $0x79] sm:$0xff] }
  0x93   : >> { %v604_v27 = vadd.f32 %v588_v22, %v571_v63  ;;  %v421_v32 = vadd.f32 %v405_v24, %v1371_v45  ;;  %v471_v25 = vmul.f32 %v1374_v46, %v1562_v20  ;;  %v642_v42 = vmul.f32 %v1390_v52, %v1459_v53 }
  0x94   : >> { %v539_v18 = vadd.f32 %v523_v61, %v486_v23  ;;  %v675_v29 = vmul.f32 %v1396_v56, %v1521_v48  ;;  %v708_v13 = vmul.f32 %v1404_v60, %v1567_v15  ;;  %v722_v30 = vadd.f32 %v706_v12, %v689_v11  ;;  %v1598_v61 = vld [vmem:[%s1379_s10 + $0x7a] sm:$0xff] }
  0x95   : >> { %v657_v33 = vadd.f32 %v641_v55, %v604_v27  ;;  %v454_v14 = vadd.f32 %v438_v35, %v421_v32  ;;  %v524_v28 = vmul.f32 %v1377_v47, %v1467_v62  ;;  %v557_v53 = vmul.f32 %v1384_v50, %v1532_v31  ;;  %v1595_v55 = vld [vmem:[%s1379_s10 + $0x80] sm:$0xff] }
  0x96   : >> { %v572_v26 = vadd.f32 %v556_v17, %v539_v18  ;;  %v406_v38 = vmul.f32 %v1365_v43, %v1476_v19  ;;  %v439_v39 = vmul.f32 %v1368_v44, %v1524_v36  ;;  %740 = vst [vmem:[%s1511_s25 + $0x18] sm:$0xff] %v722_v30  ;;  %v590_v22 = vmul.f32 %v1387_v51, %v1581_v54  ;;  %v1610_v35 = vld [vmem:[%s1379_s10 + $0x81] sm:$0xff]  ;;  %v1624_v18 = vld [vmem:[%s1379_s10 + $0x90] sm:$0xff] }
  0x97   : >> { %v690_v12 = vadd.f32 %v674_v57, %v657_v33  ;;  %v487_v49 = vadd.f32 %v471_v25, %v454_v14  ;;  %v643_v62 = vmul.f32 %v1390_v52, %v1479_v21  ;;  %v676_v19 = vmul.f32 %v1396_v56, %v1541_v16 }
  0x98   : >> { %v605_v59 = vadd.f32 %v589_v41, %v572_v26  ;;  %v422_v34 = vadd.f32 %v406_v38, %v1371_v45  ;;  %v472_v57 = vmul.f32 %v1374_v46, %v1595_v55  ;;  %v709_v21 = vmul.f32 %v1404_v60, %v1598_v61 }
  0x99   : >> { %v723_v63 = vadd.f32 %v707_v58, %v690_v12  ;;  %v540_v24 = vadd.f32 %v524_v28, %v487_v49  ;;  %v525_v23 = vmul.f32 %v1377_v47, %v1490_v37  ;;  %v407_v11 = vmul.f32 %v1365_v43, %v1502_v40  ;;  %v1627_v40 = vld [vmem:[%s1379_s10 + $0x82] sm:$0xff]  ;;  %v1639_v12 = vld [vmem:[%s1379_s10 + $0x91] sm:$0xff] }
  0x9a   : >> { %v658_v17 = vadd.f32 %v642_v42, %v605_v59  ;;  %v455_v41 = vadd.f32 %v439_v39, %v422_v34  ;;  %v440_v27 = vmul.f32 %v1368_v44, %v1562_v20  ;;  %v558_v32 = vmul.f32 %v1384_v50, %v1553_v0 }
  0x9b   : >> { %741 = vst [vmem:[%s1511_s25 + $0x20] sm:$0xff] %v723_v63  ;;  %v573_v58 = vadd.f32 %v557_v53, %v540_v24  ;;  %v591_v25 = vmul.f32 %v1387_v51, %v1610_v35  ;;  %v644_v37 = vmul.f32 %v1390_v52, %v1521_v48  ;;  %v423_v33 = vadd.f32 %v407_v11, %v1371_v45  ;;  %v1654_v24 = vld [vmem:[%s1379_s10 + $0x92] sm:$0xff] }
  0x9c   : >> { %v691_v42 = vadd.f32 %v675_v29, %v658_v17  ;;  %v488_v30 = vadd.f32 %v472_v57, %v455_v41  ;;  %v473_v14 = vmul.f32 %v1374_v46, %v1624_v18  ;;  %v677_v26 = vmul.f32 %v1396_v56, %v1567_v15  ;;  %v1648_v57 = vld [vmem:[%s1379_s10 + $0x98] sm:$0xff] }
  0x9d   : >> { %v606_v28 = vadd.f32 %v590_v22, %v573_v58  ;;  %v710_v48 = vmul.f32 %v1404_v60, %v1627_v40  ;;  %v526_v29 = vmul.f32 %v1377_v47, %v1532_v31  ;;  %v456_v39 = vadd.f32 %v440_v27, %v423_v33 }
  0x9e   : >> { %v724_v53 = vadd.f32 %v708_v13, %v691_v42  ;;  %v541_v38 = vadd.f32 %v525_v23, %v488_v30  ;;  %v408_v49 = vmul.f32 %v1365_v43, %v1524_v36  ;;  %v559_v22 = vmul.f32 %v1384_v50, %v1581_v54 }
  0x9f   : >> { %v659_v59 = vadd.f32 %v643_v62, %v606_v28  ;;  %v592_v34 = vmul.f32 %v1387_v51, %v1639_v12  ;;  %v441_v31 = vmul.f32 %v1368_v44, %v1595_v55  ;;  %v489_v63 = vadd.f32 %v473_v14, %v456_v39 }
  0xa0   : >> { %742 = vst [vmem:[%s1511_s25 + $0x28] sm:$0xff] %v724_v53  ;;  %v574_v13 = vadd.f32 %v558_v32, %v541_v38  ;;  %v424_v36 = vadd.f32 %v408_v49, %v1371_v45  ;;  %v474_v62 = vmul.f32 %v1374_v46, %v1648_v57  ;;  %v645_v17 = vmul.f32 %v1390_v52, %v1541_v16  ;;  %v1679_v38 = vld [vmem:[%s1379_s10 + $0xa8] sm:$0xff] }
  0xa1   : >> { %v692_v23 = vadd.f32 %v676_v19, %v659_v59  ;;  %v678_v41 = vmul.f32 %v1396_v56, %v1598_v61  ;;  %v711_v11 = vmul.f32 %v1404_v60, %v1654_v24  ;;  %v542_v58 = vadd.f32 %v526_v29, %v489_v63  ;;  %v1668_v19 = vld [vmem:[%s1379_s10 + $0x99] sm:$0xff] }
  0xa2   : >> { %v607_v27 = vadd.f32 %v591_v25, %v574_v13  ;;  %v457_v32 = vadd.f32 %v441_v31, %v424_v36  ;;  %v527_v42 = vmul.f32 %v1377_v47, %v1553_v0  ;;  %v560_v16 = vmul.f32 %v1384_v50, %v1610_v35  ;;  %v1683_v0 = vld [vmem:[%s1379_s10 + $0x9a] sm:$0xff] }
  0xa3   : >> { %v725_v30 = vadd.f32 %v709_v21, %v692_v23  ;;  %v409_v33 = vmul.f32 %v1365_v43, %v1562_v20  ;;  %v442_v14 = vmul.f32 %v1368_v44, %v1624_v18  ;;  %v575_v53 = vadd.f32 %v559_v22, %v542_v58  ;;  %v1706_v58 = vld [vmem:[%s1379_s10 + $0xb0] sm:$0xff] }
  0xa4   : >> { %v660_v28 = vadd.f32 %v644_v37, %v607_v27  ;;  %v490_v25 = vadd.f32 %v474_v62, %v457_v32  ;;  %v593_v29 = vmul.f32 %v1387_v51, %v1668_v19  ;;  %v646_v21 = vmul.f32 %v1390_v52, %v1567_v15 }
  0xa5   : >> { %743 = vst [vmem:[%s1511_s25 + $0x30] sm:$0xff] %v725_v30  ;;  %v679_v20 = vmul.f32 %v1396_v56, %v1627_v40  ;;  %v425_v37 = vadd.f32 %v409_v33, %v1371_v45  ;;  %v475_v39 = vmul.f32 %v1374_v46, %v1679_v38  ;;  %v608_v59 = vadd.f32 %v592_v34, %v575_v53  ;;  %v1701_v34 = vld [vmem:[%s1379_s10 + $0xa9] sm:$0xff] }
  0xa6   : >> { %v693_v49 = vadd.f32 %v677_v26, %v660_v28  ;;  %v543_v22 = vadd.f32 %v527_v42, %v490_v25  ;;  %v712_v31 = vmul.f32 %v1404_v60, %v1683_v0  ;;  %v528_v15 = vmul.f32 %v1377_v47, %v1581_v54  ;;  %v1715_v30 = vld [vmem:[%s1379_s10 + $0xaa] sm:$0xff] }
  0xa7   : >> { %v458_v13 = vadd.f32 %v442_v14, %v425_v37  ;;  %v410_v63 = vmul.f32 %v1365_v43, %v1595_v55  ;;  %v443_v36 = vmul.f32 %v1368_v44, %v1648_v57  ;;  %v661_v23 = vadd.f32 %v645_v17, %v608_v59  ;;  %v1726_v37 = vld [vmem:[%s1379_s10 + $0xb1] sm:$0xff] }
  0xa8   : >> { %v726_v62 = vadd.f32 %v710_v48, %v693_v49  ;;  %v576_v26 = vadd.f32 %v560_v16, %v543_v22  ;;  %v561_v27 = vmul.f32 %v1384_v50, %v1639_v12  ;;  %v594_v54 = vmul.f32 %v1387_v51, %v1701_v34 }
  0xa9   : >> { %v491_v32 = vadd.f32 %v475_v39, %v458_v13  ;;  %v426_v55 = vadd.f32 %v410_v63, %v1371_v45  ;;  %v476_v42 = vmul.f32 %v1374_v46, %v1706_v58  ;;  %v694_v48 = vadd.f32 %v678_v41, %v661_v23 }
  0xaa   : >> { %744 = vst [vmem:[%s1511_s25 + $0x38] sm:$0xff] %v726_v62  ;;  %v609_v17 = vadd.f32 %v593_v29, %v576_v26  ;;  %v647_v16 = vmul.f32 %v1390_v52, %v1598_v61  ;;  %v680_v33 = vmul.f32 %v1396_v56, %v1654_v24  ;;  %v713_v28 = vmul.f32 %v1404_v60, %v1715_v30 }
  0xab   : >> { %v544_v14 = vadd.f32 %v528_v15, %v491_v32  ;;  %v459_v53 = vadd.f32 %v443_v36, %v426_v55  ;;  %v529_v41 = vmul.f32 %v1377_v47, %v1610_v35  ;;  %v727_v25 = vadd.f32 %v711_v11, %v694_v48  ;;  %v394_v15 = vld [vmem:[%s1379_s10 + $0xc0] sm:$0xff]  ;;  %v1739_v11 = vld [vmem:[%s1379_s10 + $0xb2] sm:$0xff] }
  0xac   : >> { %v662_v29 = vadd.f32 %v646_v21, %v609_v17  ;;  %v411_v61 = vmul.f32 %v1365_v43, %v1624_v18  ;;  %v444_v39 = vmul.f32 %v1368_v44, %v1679_v38  ;;  %v562_v22 = vmul.f32 %v1384_v50, %v1668_v19  ;;  %v513_v48 = vld [vmem:[%s1379_s10 + $0xc1] sm:$0xff] }
  0xad   : >> { %v577_v49 = vadd.f32 %v561_v27, %v544_v14  ;;  %v492_v59 = vadd.f32 %v476_v42, %v459_v53  ;;  %v595_v13 = vmul.f32 %v1387_v51, %v1726_v37  ;;  %745 = vst [vmem:[%s1511_s25 + $0x40] sm:$0xff] %v727_v25  ;;  %v648_v18 = vmul.f32 %v1390_v52, %v1627_v40  ;;  %v395_v17 = vld [vmem:[%s1379_s10 + $0xc8] sm:$0xff] }
  0xae   : >> { %v695_v35 = vadd.f32 %v679_v20, %v662_v29  ;;  %v427_v21 = vadd.f32 %v411_v61, %v1371_v45  ;;  %v477_v63 = vmul.f32 %v1374_v46, %v394_v15  ;;  %v681_v23 = vmul.f32 %v1396_v56, %v1683_v0  ;;  %v632_v25 = vld [vmem:[%s1379_s10 + $0xc2] sm:$0xff] }
  0xaf   : >> { %v610_v36 = vadd.f32 %v594_v54, %v577_v49  ;;  %v545_v62 = vadd.f32 %v529_v41, %v492_v59  ;;  %v714_v26 = vmul.f32 %v1404_v60, %v1739_v11  ;;  %v530_v32 = vmul.f32 %v1377_v47, %v1639_v12 }
  0xb0   : >> { %v728_v20 = vadd.f32 %v712_v31, %v695_v35  ;;  %v460_v27 = vadd.f32 %v444_v39, %v427_v21  ;;  %v412_v40 = vmul.f32 %v1365_v43, %v1648_v57  ;;  %v563_v54 = vmul.f32 %v1384_v50, %v1701_v34  ;;  %v396_v35 = vld [vmem:[%s1379_s10 + $0xd8] sm:$0xff] }
  0xb1   : >> { %v663_v55 = vadd.f32 %v647_v16, %v610_v36  ;;  %v578_v42 = vadd.f32 %v562_v22, %v545_v62  ;;  %v445_v14 = vmul.f32 %v1368_v44, %v1706_v58  ;;  %v596_v53 = vmul.f32 %v1387_v51, %v513_v48 }
  0xb2   : >> { %746 = vst [vmem:[%s1511_s25 + $0x48] sm:$0xff] %v728_v20  ;;  %v493_v31 = vadd.f32 %v477_v63, %v460_v27  ;;  %v428_v12 = vadd.f32 %v412_v40, %v1371_v45  ;;  %v478_v57 = vmul.f32 %v1374_v46, %v395_v17  ;;  %v649_v29 = vmul.f32 %v1390_v52, %v1654_v24 }
  0xb3   : >> { %v696_v16 = vadd.f32 %v680_v33, %v663_v55  ;;  %v611_v41 = vadd.f32 %v595_v13, %v578_v42  ;;  %v682_v61 = vmul.f32 %v1396_v56, %v1715_v30  ;;  %v715_v49 = vmul.f32 %v1404_v60, %v632_v25  ;;  %v514_v13 = vld [vmem:[%s1379_s10 + $0xc9] sm:$0xff]  ;;  %v515_v42 = vld [vmem:[%s1379_s10 + $0xd9] sm:$0xff] }
  0xb4   : >> { %v546_v39 = vadd.f32 %v530_v32, %v493_v31  ;;  %v461_v59 = vadd.f32 %v445_v14, %v428_v12  ;;  %v531_v22 = vmul.f32 %v1377_v47, %v1668_v19  ;;  %v413_v24 = vmul.f32 %v1365_v43, %v1679_v38  ;;  %v397_v32 = vld [vmem:[%s1379_s10 + $0xe0] sm:$0xff] }
  0xb5   : >> { %v729_v21 = vadd.f32 %v713_v28, %v696_v16  ;;  %v664_v33 = vadd.f32 %v648_v18, %v611_v41  ;;  %v446_v63 = vmul.f32 %v1368_v44, %v394_v15  ;;  %v564_v20 = vmul.f32 %v1384_v50, %v1726_v37  ;;  %v516_v12 = vld [vmem:[%s1379_s10 + $0xe1] sm:$0xff] }
  0xb6   : >> { %v579_v36 = vadd.f32 %v563_v54, %v546_v39  ;;  %v494_v62 = vadd.f32 %v478_v57, %v461_v59  ;;  %v597_v27 = vmul.f32 %v1387_v51, %v514_v13  ;;  %v650_v28 = vmul.f32 %v1390_v52, %v1683_v0  ;;  %v635_v59 = vld [vmem:[%s1379_s10 + $0xe2] sm:$0xff] }
  0xb7   : >> { %747 = vst [vmem:[%s1511_s25 + $0x50] sm:$0xff] %v729_v21  ;;  %v697_v19 = vadd.f32 %v681_v23, %v664_v33  ;;  %v429_v18 = vadd.f32 %v413_v24, %v1371_v45  ;;  %v479_v38 = vmul.f32 %v1374_v46, %v396_v35  ;;  %v683_v55 = vmul.f32 %v1396_v56, %v1739_v11 }
  0xb8   : >> { %v612_v15 = vadd.f32 %v596_v53, %v579_v36  ;;  %v547_v40 = vadd.f32 %v531_v22, %v494_v62  ;;  %v532_v23 = vmul.f32 %v1377_v47, %v1701_v34  ;;  %v565_v0 = vmul.f32 %v1384_v50, %v513_v48  ;;  %v633_v53 = vld [vmem:[%s1379_s10 + $0xca] sm:$0xff] }
  0xb9   : >> { %v730_v54 = vadd.f32 %v714_v26, %v697_v19  ;;  %v462_v14 = vadd.f32 %v446_v63, %v429_v18  ;;  %v414_v31 = vmul.f32 %v1365_v43, %v1706_v58  ;;  %v447_v41 = vmul.f32 %v1368_v44, %v395_v17 }
  0xba   : >> { %v665_v57 = vadd.f32 %v649_v29, %v612_v15  ;;  %v580_v16 = vadd.f32 %v564_v20, %v547_v40  ;;  %v480_v39 = vmul.f32 %v1374_v46, %v397_v32  ;;  %v598_v34 = vmul.f32 %v1387_v51, %v515_v42 }
  0xbb   : >> { %748 = vst [vmem:[%s1511_s25 + $0x58] sm:$0xff] %v730_v54  ;;  %v495_v22 = vadd.f32 %v479_v38, %v462_v14  ;;  %v430_v26 = vadd.f32 %v414_v31, %v1371_v45  ;;  %v566_v48 = vmul.f32 %v1384_v50, %v514_v13  ;;  %v533_v58 = vmul.f32 %v1377_v47, %v1726_v37 }
  0xbc   : >> { %v698_v35 = vadd.f32 %v682_v61, %v665_v57  ;;  %v613_v43 = vadd.f32 %v597_v27, %v580_v16  ;;  %v599_v44 = vmul.f32 %v1387_v51, %v516_v12  ;;  %v685_v29 = vmul.f32 %v1396_v56, %v633_v53  ;;  %v634_v51 = vld [vmem:[%s1379_s10 + $0xda] sm:$0xff] }
  0xbd   : >> { %v548_v17 = vadd.f32 %v532_v23, %v495_v22  ;;  %v463_v46 = vadd.f32 %v447_v41, %v430_v26  ;;  %v718_v21 = vmul.f32 %v1404_v60, %v635_v59  ;;  %v716_v45 = vmul.f32 %v1404_v60, %v633_v53 }
  0xbe   : >> { %v731_v33 = vadd.f32 %v715_v49, %v698_v35  ;;  %v666_v24 = vadd.f32 %v650_v28, %v613_v43  ;;  %v651_v61 = vmul.f32 %v1390_v52, %v1715_v30  ;;  %v684_v63 = vmul.f32 %v1396_v56, %v632_v25 }
  0xbf   : >> { %v581_v50 = vadd.f32 %v565_v0, %v548_v17  ;;  %v496_v13 = vadd.f32 %v480_v39, %v463_v46  ;;  %v717_v20 = vmul.f32 %v1404_v60, %v634_v51  ;;  %v652_v19 = vmul.f32 %v1390_v52, %v1739_v11 }
  0xc0   : >> { %749 = vst [vmem:[%s1511_s25 + $0x60] sm:$0xff] %v731_v33  ;;  %v699_v47 = vadd.f32 %v683_v55, %v666_v24 }
  0xc1   : >> { %v614_v37 = vadd.f32 %v598_v34, %v581_v50  ;;  %v549_v36 = vadd.f32 %v533_v58, %v496_v13 }
  0xc2   : >> { %v732_v62 = vadd.f32 %v716_v45, %v699_v47 }
  0xc3   : >> { %v667_v49 = vadd.f32 %v651_v61, %v614_v37  ;;  %v582_v27 = vadd.f32 %v566_v48, %v549_v36 }
  0xc4   : >> { %750 = vst [vmem:[%s1511_s25 + $0x68] sm:$0xff] %v732_v62 }
  0xc5   : >> { %v700_v30 = vadd.f32 %v684_v63, %v667_v49  ;;  %v615_v28 = vadd.f32 %v599_v44, %v582_v27 }
  0xc7   : >> { %v733_v18 = vadd.f32 %v717_v20, %v700_v30  ;;  %v668_v38 = vadd.f32 %v652_v19, %v615_v28 }
  0xc9   : >> { %751 = vst [vmem:[%s1511_s25 + $0x70] sm:$0xff] %v733_v18  ;;  %v701_v32 = vadd.f32 %v685_v29, %v668_v38  ;;  %370 = sbr.rel (!%p368_p1) target bundleno = 116 (0x74), region = 98 }
  0xcb   : >> { %v734_v15 = vadd.f32 %v718_v21, %v701_v32 }
  0xcd   : >> { %752 = vst [vmem:[%s1511_s25 + $0x78] sm:$0xff] %v734_v15 }
  0xce   : > { %1087 = shalt.err (!%p1084_p3)
}
  0xcf   : > { %s1162_s6 = smov 128   ;;  %s1163_s22 = smov 8  }
  0xd0   : > { %918 = dma.vmem_to_hbm [thread:$0]  (%p1263_p5), %s768_s30, 4096, %s770_s4, %s754_s9, %s1162_s6, %s1162_s6, %s1163_s22  }
  0xd1 PF: > { %s784_s10 = sand.u32 1, %s1130_s12   ;;  %p929_p7 = pnand %p893_p11, %p1233_p6 }
  0xd2   : > { %s785_s24 = scalar_lea.sflag [#allocation5], %s784_s10 }
  0xd3   : > { %p930_p9 = pneg %p929_p7 }
  0xd5   : > { %1125 = dma.done.wait (%p930_p9), %s785_s24, 4096  }
  0xd6   : > { %1127 = vsyncadd (%p930_p9), %s785_s24, 4294963200  ;;  %s20_s17 = sadd.s32 1, %s1150_s17   ;;  %s1874_s12 = smov %s1134_s13 }
  0xd7   : > { %p17_p2 = scmp.ge.s32.totalorder %s20_s17, 4   ;;  %s1875_s13 = smov %s1138_s14 }
  0xd8   : > { %s1876_s14 = smov %s1272_s18  ;;  %s1877_s15 = smov %s1146_s16 }
  0xd9   : > { %s1878_s16 = smov %s1880_s5  ;;  %19 = sbr.rel (!%p17_p2) target bundleno = 9 (0x9), region = 109 }
  0xde   :  { %791 = vsyncpa [#allocation4], 1 }
  0xdf   :  { %793 = vsyncpa [#allocation4 + $0x1], 1 }
  0xe0   :  { %794 = vsyncpa [#allocation7], 1 }
  0xe1   :  { %795 = vsyncpa [#allocation5], 1 }
  0xe2   :  { %797 = vsyncpa [#allocation5 + $0x1], 1 }

</bundles_post_ra>
